<compile_context>
chip_gen: v7x
topology: tpu7x:2x2x1
jax: 0.10.0
libtpu: 0.0.40
codegen_flags: <defaults>
</compile_context>

<pallas_src>
import jax
import jax.numpy as jnp
from jax.experimental import pallas as pl
from jax.experimental.pallas import tpu as pltpu


def _make_bag_kernel(H, W, C_in, C_out):
    HW = H * W
    taps = [(dy, dx) for dy in (-1, 0, 1) for dx in (-1, 0, 1)]

    def kernel(p_ref, i_ref, d_ref, scale_ref, shift_ref, mask_ref, w_ref, o_ref):
        # Block = one batch element: channels on sublanes, H*W on lanes.
        P = p_ref[0].astype(jnp.float32)            # (C_in, HW)
        I = i_ref[0].astype(jnp.float32)
        D = d_ref[0].astype(jnp.float32)

        # --- attention blend:  P*att + (1-att)*I -----------------------------
        att = jax.nn.sigmoid(D)
        x = att * (P - I) + I

        # --- folded eval-mode BatchNorm + ReLU --------------------------------
        x = x * scale_ref[...] + shift_ref[...]     # (C_in, 1) broadcasts over lanes
        x = jnp.maximum(x, 0.0)

        # --- 3x3 SAME conv: 9 lane-rolls + border masks -> ONE MXU matmul -----
        masks = mask_ref[...]                       # (9, HW) float {0,1}
        parts = []
        for t, (dy, dx) in enumerate(taps):
            off = dy * W + dx
            if off == 0:
                parts.append(x)                     # center tap: no shift, mask == 1
            else:
                shifted = pltpu.roll(x, shift=(-off) % HW, axis=1)   # XLU, ~free
                parts.append(shifted * masks[t:t + 1, :])
        stacked = jnp.concatenate(parts, axis=0).astype(jnp.bfloat16)   # (9*C_in, HW)

        out = jnp.dot(w_ref[...], stacked,          # (C_out, 9*C_in) @ (9*C_in, HW)
                      preferred_element_type=jnp.float32)
        o_ref[0] = out.astype(o_ref.dtype)          # (C_out, HW): lane-dense store

    return kernel


@jax.jit
def bag_forward(P, I, D, scale, shift, w_oihw):
    """P, I, D: (N, C_in, H, W). scale/shift: (C_in,) folded BN. w_oihw: (C_out, C_in, 3, 3)."""
    N, C_in, H, W = P.shape
    C_out = w_oihw.shape[0]
    HW = H * W

    # NCHW kept; flattening (H, W) -> H*W is a free reshape (no transpose).
    p = P.reshape(N, C_in, HW)
    i = I.reshape(N, C_in, HW)
    d = D.reshape(N, C_in, HW)
    scale2 = scale.reshape(C_in, 1).astype(jnp.float32)
    shift2 = shift.reshape(C_in, 1).astype(jnp.float32)

    # Conv weight as (C_out, 9*C_in), tap-major (ky, kx, ci), bf16 for the MXU.
    w_mat = jnp.transpose(w_oihw, (0, 2, 3, 1)).reshape(C_out, 9 * C_in)
    w_mat = w_mat.astype(jnp.bfloat16)

    # SAME-padding border masks per tap, (9, HW) — compile-time constants.
    pos = jnp.arange(HW, dtype=jnp.int32)
    row, col = pos // W, pos % W
    masks = jnp.stack(
        [((row + dy) >= 0) & ((row + dy) < H) & ((col + dx) >= 0) & ((col + dx) < W)
         for dy in (-1, 0, 1) for dx in (-1, 0, 1)]
    ).astype(jnp.float32)

    out = pl.pallas_call(
        _make_bag_kernel(H, W, C_in, C_out),
        out_shape=jax.ShapeDtypeStruct((N, C_out, HW), P.dtype),
        grid_spec=pltpu.PrefetchScalarGridSpec(
            num_scalar_prefetch=0,
            grid=(N,),
            in_specs=[
                pl.BlockSpec((1, C_in, HW), lambda n: (n, 0, 0)),    # P
                pl.BlockSpec((1, C_in, HW), lambda n: (n, 0, 0)),    # I
                pl.BlockSpec((1, C_in, HW), lambda n: (n, 0, 0)),    # D
                pl.BlockSpec((C_in, 1), lambda n: (0, 0)),           # BN scale (folded)
                pl.BlockSpec((C_in, 1), lambda n: (0, 0)),           # BN shift (folded)
                pl.BlockSpec((9, HW), lambda n: (0, 0)),             # border masks
                pl.BlockSpec((C_out, 9 * C_in), lambda n: (0, 0)),   # conv weight
            ],
            out_specs=pl.BlockSpec((1, C_out, HW), lambda n: (n, 0, 0)),
        ),
        compiler_params=pltpu.CompilerParams(
            dimension_semantics=("parallel",)),
    )(p, i, d, scale2, shift2, masks, w_mat)

    return out.reshape(N, C_out, H, W)


def bag_reference(P, I, D, gamma, beta, mean, var, w_oihw, eps=1e-5):
    """Pure-JAX reference of the PyTorch forward (eval-mode BN), NCHW."""
    att = jax.nn.sigmoid(D)
    x = P * att + (1.0 - att) * I
    x = (x - mean[None, :, None, None]) / jnp.sqrt(var + eps)[None, :, None, None]
    x = x * gamma[None, :, None, None] + beta[None, :, None, None]
    x = jnp.maximum(x, 0.0)
    return jax.lax.conv_general_dilated(
        x, w_oihw, window_strides=(1, 1), padding="SAME",
        dimension_numbers=("NCHW", "OIHW", "NCHW"))


if __name__ == "__main__":
    key = jax.random.PRNGKey(0)
    kP, kI, kD, kW = jax.random.split(key, 4)

    N, in_dim, out_dim, H, W = 2, 4, 8, 16, 16
    eps = 1e-5

    P = jax.random.normal(kP, (N, in_dim, H, W), dtype=jnp.float32)
    I = jax.random.normal(kI, (N, in_dim, H, W), dtype=jnp.float32)
    D = jax.random.normal(kD, (N, in_dim, H, W), dtype=jnp.float32)

    # Deterministic synthetic parameters (eval-mode BN stats + conv weight):
    gamma = 1.0 + 0.1 * jnp.arange(in_dim, dtype=jnp.float32)    # BN weight
    beta = 0.05 * jnp.arange(in_dim, dtype=jnp.float32)          # BN bias
    mean = 0.02 * jnp.arange(in_dim, dtype=jnp.float32)          # BN running_mean
    var = 1.0 + 0.03 * jnp.arange(in_dim, dtype=jnp.float32)     # BN running_var
    w_oihw = 0.1 * jax.random.normal(kW, (out_dim, in_dim, 3, 3), dtype=jnp.float32)

    # Fold BN into per-channel scale/shift (eval mode).
    scale = gamma / jnp.sqrt(var + eps)
    shift = beta - mean * scale

    out = bag_forward(P, I, D, scale, shift, w_oihw)
    out = jax.block_until_ready(out)

    ref = bag_reference(P, I, D, gamma, beta, mean, var, w_oihw, eps)
    assert out.shape == (N, out_dim, H, W), out.shape
    # bf16 MXU operands + f32 accumulate: slightly looser than pure f32.
    assert jnp.allclose(out, ref, atol=2e-2, rtol=2e-2), float(jnp.max(jnp.abs(out - ref)))

    print("KERNEL_OK")
</pallas_src>

<mosaic_0001>
module attributes {stable_mosaic.version = 11 : i64} {
  func.func @kernel(%arg0: i32, %arg1: memref<1x4x256xf32, #tpu.memory_space<vmem>>, %arg2: memref<1x4x256xf32, #tpu.memory_space<vmem>>, %arg3: memref<1x4x256xf32, #tpu.memory_space<vmem>>, %arg4: memref<4x1xf32, #tpu.memory_space<vmem>>, %arg5: memref<4x1xf32, #tpu.memory_space<vmem>>, %arg6: memref<9x256xf32, #tpu.memory_space<vmem>>, %arg7: memref<8x36xbf16, #tpu.memory_space<vmem>>, %arg8: memref<1x8x256xf32, #tpu.memory_space<vmem>>) attributes {dimension_semantics = [#tpu.dimension_semantics<parallel>], iteration_bounds = array<i64: 2>, scalar_prefetch = 0 : i64, scratch_operands = 0 : i64, tpu.core_type = #tpu.core_type<tc>, window_params = [{transform_indices = @transform_0, window_bounds = array<i64: 1, 4, 256>}, {transform_indices = @transform_1, window_bounds = array<i64: 1, 4, 256>}, {transform_indices = @transform_2, window_bounds = array<i64: 1, 4, 256>}, {pipeline_mode = #tpu.pipeline_mode<synchronous>, transform_indices = @transform_3, window_bounds = array<i64: 4, 1>}, {pipeline_mode = #tpu.pipeline_mode<synchronous>, transform_indices = @transform_4, window_bounds = array<i64: 4, 1>}, {pipeline_mode = #tpu.pipeline_mode<synchronous>, transform_indices = @transform_5, window_bounds = array<i64: 9, 256>}, {pipeline_mode = #tpu.pipeline_mode<synchronous>, transform_indices = @transform_6, window_bounds = array<i64: 8, 36>}, {transform_indices = @transform_7, window_bounds = array<i64: 1, 8, 256>}]} {
    %c0 = arith.constant 0 : index
    %c0_0 = arith.constant 0 : index
    %c0_1 = arith.constant 0 : index
    %0 = vector.load %arg1[%c0, %c0_0, %c0_1] : memref<1x4x256xf32, #tpu.memory_space<vmem>>, vector<1x4x256xf32>
    %1 = vector.shape_cast %0 : vector<1x4x256xf32> to vector<4x256xf32>
    %c0_2 = arith.constant 0 : index
    %c0_3 = arith.constant 0 : index
    %c0_4 = arith.constant 0 : index
    %2 = vector.load %arg2[%c0_2, %c0_3, %c0_4] : memref<1x4x256xf32, #tpu.memory_space<vmem>>, vector<1x4x256xf32>
    %3 = vector.shape_cast %2 : vector<1x4x256xf32> to vector<4x256xf32>
    %c0_5 = arith.constant 0 : index
    %c0_6 = arith.constant 0 : index
    %c0_7 = arith.constant 0 : index
    %4 = vector.load %arg3[%c0_5, %c0_6, %c0_7] : memref<1x4x256xf32, #tpu.memory_space<vmem>>, vector<1x4x256xf32>
    %5 = vector.shape_cast %4 : vector<1x4x256xf32> to vector<4x256xf32>
    %6 = arith.negf %5 : vector<4x256xf32>
    %7 = math.exp %6 : vector<4x256xf32>
    %cst = arith.constant 1.000000e+00 : f32
    %8 = vector.broadcast %cst : f32 to vector<4x256xf32>
    %9 = arith.addf %8, %7 : vector<4x256xf32>
    %10 = arith.divf %8, %9 : vector<4x256xf32>
    %11 = arith.subf %1, %3 : vector<4x256xf32>
    %12 = arith.mulf %10, %11 : vector<4x256xf32>
    %13 = arith.addf %12, %3 : vector<4x256xf32>
    %c0_8 = arith.constant 0 : index
    %c0_9 = arith.constant 0 : index
    %14 = vector.load %arg4[%c0_8, %c0_9] : memref<4x1xf32, #tpu.memory_space<vmem>>, vector<4x1xf32>
    %15 = vector.broadcast %14 : vector<4x1xf32> to vector<4x256xf32>
    %16 = arith.mulf %13, %15 : vector<4x256xf32>
    %c0_10 = arith.constant 0 : index
    %c0_11 = arith.constant 0 : index
    %17 = vector.load %arg5[%c0_10, %c0_11] : memref<4x1xf32, #tpu.memory_space<vmem>>, vector<4x1xf32>
    %18 = vector.broadcast %17 : vector<4x1xf32> to vector<4x256xf32>
    %19 = arith.addf %16, %18 : vector<4x256xf32>
    %cst_12 = arith.constant 0.000000e+00 : f32
    %20 = vector.broadcast %cst_12 : f32 to vector<4x256xf32>
    %21 = arith.maximumf %19, %20 : vector<4x256xf32>
    %c0_13 = arith.constant 0 : index
    %c0_14 = arith.constant 0 : index
    %22 = vector.load %arg6[%c0_13, %c0_14] : memref<9x256xf32, #tpu.memory_space<vmem>>, vector<9x256xf32>
    %c17_i32 = arith.constant 17 : i32
    %23 = tpu.dynamic_rotate %21 by %c17_i32 dim 1 : vector<4x256xf32>, i32 -> vector<4x256xf32>
    %24 = vector.extract_strided_slice %22 {offsets = [0, 0], sizes = [1, 256], strides = [1, 1]} : vector<9x256xf32> to vector<1x256xf32>
    %25 = vector.broadcast %24 : vector<1x256xf32> to vector<4x256xf32>
    %26 = arith.mulf %23, %25 : vector<4x256xf32>
    %c16_i32 = arith.constant 16 : i32
    %27 = tpu.dynamic_rotate %21 by %c16_i32 dim 1 : vector<4x256xf32>, i32 -> vector<4x256xf32>
    %28 = vector.extract_strided_slice %22 {offsets = [1, 0], sizes = [1, 256], strides = [1, 1]} : vector<9x256xf32> to vector<1x256xf32>
    %29 = vector.broadcast %28 : vector<1x256xf32> to vector<4x256xf32>
    %30 = arith.mulf %27, %29 : vector<4x256xf32>
    %c15_i32 = arith.constant 15 : i32
    %31 = tpu.dynamic_rotate %21 by %c15_i32 dim 1 : vector<4x256xf32>, i32 -> vector<4x256xf32>
    %32 = vector.extract_strided_slice %22 {offsets = [2, 0], sizes = [1, 256], strides = [1, 1]} : vector<9x256xf32> to vector<1x256xf32>
    %33 = vector.broadcast %32 : vector<1x256xf32> to vector<4x256xf32>
    %34 = arith.mulf %31, %33 : vector<4x256xf32>
    %c1_i32 = arith.constant 1 : i32
    %35 = tpu.dynamic_rotate %21 by %c1_i32 dim 1 : vector<4x256xf32>, i32 -> vector<4x256xf32>
    %36 = vector.extract_strided_slice %22 {offsets = [3, 0], sizes = [1, 256], strides = [1, 1]} : vector<9x256xf32> to vector<1x256xf32>
    %37 = vector.broadcast %36 : vector<1x256xf32> to vector<4x256xf32>
    %38 = arith.mulf %35, %37 : vector<4x256xf32>
    %c255_i32 = arith.constant 255 : i32
    %39 = tpu.dynamic_rotate %21 by %c255_i32 dim 1 : vector<4x256xf32>, i32 -> vector<4x256xf32>
    %40 = vector.extract_strided_slice %22 {offsets = [5, 0], sizes = [1, 256], strides = [1, 1]} : vector<9x256xf32> to vector<1x256xf32>
    %41 = vector.broadcast %40 : vector<1x256xf32> to vector<4x256xf32>
    %42 = arith.mulf %39, %41 : vector<4x256xf32>
    %c241_i32 = arith.constant 241 : i32
    %43 = tpu.dynamic_rotate %21 by %c241_i32 dim 1 : vector<4x256xf32>, i32 -> vector<4x256xf32>
    %44 = vector.extract_strided_slice %22 {offsets = [6, 0], sizes = [1, 256], strides = [1, 1]} : vector<9x256xf32> to vector<1x256xf32>
    %45 = vector.broadcast %44 : vector<1x256xf32> to vector<4x256xf32>
    %46 = arith.mulf %43, %45 : vector<4x256xf32>
    %c240_i32 = arith.constant 240 : i32
    %47 = tpu.dynamic_rotate %21 by %c240_i32 dim 1 : vector<4x256xf32>, i32 -> vector<4x256xf32>
    %48 = vector.extract_strided_slice %22 {offsets = [7, 0], sizes = [1, 256], strides = [1, 1]} : vector<9x256xf32> to vector<1x256xf32>
    %49 = vector.broadcast %48 : vector<1x256xf32> to vector<4x256xf32>
    %50 = arith.mulf %47, %49 : vector<4x256xf32>
    %c239_i32 = arith.constant 239 : i32
    %51 = tpu.dynamic_rotate %21 by %c239_i32 dim 1 : vector<4x256xf32>, i32 -> vector<4x256xf32>
    %52 = vector.extract_strided_slice %22 {offsets = [8, 0], sizes = [1, 256], strides = [1, 1]} : vector<9x256xf32> to vector<1x256xf32>
    %53 = vector.broadcast %52 : vector<1x256xf32> to vector<4x256xf32>
    %54 = arith.mulf %51, %53 : vector<4x256xf32>
    %55 = tpu.concatenate %26, %30, %34, %38, %21, %42, %46, %50, %54 in 0 : vector<4x256xf32>, vector<4x256xf32>, vector<4x256xf32>, vector<4x256xf32>, vector<4x256xf32>, vector<4x256xf32>, vector<4x256xf32>, vector<4x256xf32>, vector<4x256xf32> -> vector<36x256xf32>
    %56 = arith.truncf %55 : vector<36x256xf32> to vector<36x256xbf16>
    %c0_15 = arith.constant 0 : index
    %c0_16 = arith.constant 0 : index
    %57 = vector.load %arg7[%c0_15, %c0_16] : memref<8x36xbf16, #tpu.memory_space<vmem>>, vector<8x36xbf16>
    %cst_17 = arith.constant dense<0.000000e+00> : vector<8x256xf32>
    %58 = tpu.matmul %57, %56, %cst_17 {dimension_numbers = #tpu.dot_dimension_numbers<[1], [0], [0], [1], [0, 0, 1, 1], [], []>} : vector<8x36xbf16>, vector<36x256xbf16>, vector<8x256xf32> -> vector<8x256xf32>
    %c0_18 = arith.constant 0 : index
    %c0_19 = arith.constant 0 : index
    %c0_20 = arith.constant 0 : index
    %59 = vector.load %arg8[%c0_18, %c0_19, %c0_20] : memref<1x8x256xf32, #tpu.memory_space<vmem>>, vector<1x8x256xf32>
    %60 = vector.shape_cast %59 : vector<1x8x256xf32> to vector<8x256xf32>
    %61 = vector.shape_cast %58 : vector<8x256xf32> to vector<1x8x256xf32>
    tpu.vector_store %arg8[%c0_18, %c0_19, %c0_20], %61 {strides = array<i32>} : memref<1x8x256xf32, #tpu.memory_space<vmem>>, vector<1x8x256xf32>,
    return
  }
  func.func @transform_0(%arg0: i32) -> (i32, i32, i32) {
    %c0_i32 = arith.constant 0 : i32
    %c0_i32_0 = arith.constant 0 : i32
    %c0_i32_1 = arith.constant 0 : i32
    return %arg0, %c0_i32, %c0_i32_0 : i32, i32, i32
  }
  func.func @transform_1(%arg0: i32) -> (i32, i32, i32) {
    %c0_i32 = arith.constant 0 : i32
    %c0_i32_0 = arith.constant 0 : i32
    %c0_i32_1 = arith.constant 0 : i32
    return %arg0, %c0_i32, %c0_i32_0 : i32, i32, i32
  }
  func.func @transform_2(%arg0: i32) -> (i32, i32, i32) {
    %c0_i32 = arith.constant 0 : i32
    %c0_i32_0 = arith.constant 0 : i32
    %c0_i32_1 = arith.constant 0 : i32
    return %arg0, %c0_i32, %c0_i32_0 : i32, i32, i32
  }
  func.func @transform_3(%arg0: i32) -> (i32, i32) {
    %c0_i32 = arith.constant 0 : i32
    %c0_i32_0 = arith.constant 0 : i32
    %c0_i32_1 = arith.constant 0 : i32
    return %c0_i32, %c0_i32_0 : i32, i32
  }
  func.func @transform_4(%arg0: i32) -> (i32, i32) {
    %c0_i32 = arith.constant 0 : i32
    %c0_i32_0 = arith.constant 0 : i32
    %c0_i32_1 = arith.constant 0 : i32
    return %c0_i32, %c0_i32_0 : i32, i32
  }
  func.func @transform_5(%arg0: i32) -> (i32, i32) {
    %c0_i32 = arith.constant 0 : i32
    %c0_i32_0 = arith.constant 0 : i32
    %c0_i32_1 = arith.constant 0 : i32
    return %c0_i32, %c0_i32_0 : i32, i32
  }
  func.func @transform_6(%arg0: i32) -> (i32, i32) {
    %c0_i32 = arith.constant 0 : i32
    %c0_i32_0 = arith.constant 0 : i32
    %c0_i32_1 = arith.constant 0 : i32
    return %c0_i32, %c0_i32_0 : i32, i32
  }
  func.func @transform_7(%arg0: i32) -> (i32, i32, i32) {
    %c0_i32 = arith.constant 0 : i32
    %c0_i32_0 = arith.constant 0 : i32
    %c0_i32_1 = arith.constant 0 : i32
    return %arg0, %c0_i32, %c0_i32_0 : i32, i32, i32
  }
}

</mosaic_0001>

<bundles_post_ra>
// kernel: bag_forward.1
= control target key start
LH: loop header
LB: loop body
LE: loop exit
PB: predicated region body
PF: predicated region fallthrough
CT: control target
= control target key end

     0   :  { %s784_s24 = smov 0   ;;  %s910_s0 = inlined_call_operand.vmem [shape: f32[2,4,256], index: 0, kind: input, shape index: {}]   ;;  %s911_s1 = inlined_call_operand.vmem [shape: f32[2,4,256], index: 1, kind: input, shape index: {}]   ;;  %s912_s2 = inlined_call_operand.vmem [shape: f32[2,4,256], index: 2, kind: input, shape index: {}]   ;;  %s913_s3 = inlined_call_operand.vmem [shape: f32[4,1], index: 3, kind: input, shape index: {}]   ;;  %s914_s4 = inlined_call_operand.vmem [shape: f32[4,1], index: 4, kind: input, shape index: {}]   ;;  %s915_s5 = inlined_call_operand.vmem [shape: f32[9,256], index: 5, kind: input, shape index: {}]   ;;  %s916_s6 = inlined_call_operand.vmem [shape: bf16[8,36], index: 6, kind: input, shape index: {}]   ;;  %s917_s7 = inlined_call_operand.vmem [shape: f32[2,8,256], index: 7, kind: output, shape index: {}]  }
   0x1 LB: > { %s679_s25 = sadd.s32 4294967295, %s732_s24   ;;  %p683_p0 = scmp.ge.s32.totalorder %s732_s24, 1  ;;  %s732_s24 = sphi %s784_s24, %s17_s24  }
   0x2   : > { %p257_p1 = scmp.lt.s32.totalorder %s732_s24, 3 }
   0x4   : > { %p258_p2 = pnand %p683_p0, %p257_p1 }
   0x5   : > { %v332_v0 = vld [vmem:[%s913_s3] sm:$0xf] (!%p258_p2)  ;;  %v734_v1 = vmov (!%p258_p2), 0   ;;  %p299_p3 = scmp.lt.s32.totalorder (!%p258_p2), %s679_s25, 1  ;;  %v735_v7 = vmov (!%p258_p2), 839922192   ;;  %v340_v9 = vlaneseq (!%p258_p2) }
   0x6   : > { %261 = sbr.rel (%p258_p2) target bundleno = 517 (0x205), region = 48  ;;  %721 = vset.pattern.permute.xlu0 (!%p258_p2), %v734_v1  ;;  %589 = vmatprep.mubr.bf16.mxu0 (!%p258_p2), %v734_v1  ;;  %v346_v2 = vld [vmem:[%s914_s4] sm:$0xf] (!%p258_p2)  ;;  %v338_v8 = vunpack.c.l.s4 (!%p258_p2), %v735_v7  ;;  %s736_s17 = smov (!%p258_p2), 1   ;;  %v847_v35 = vld [vmem:[%s915_s5 + $0x8] sm:$0xff] (!%p258_p2)  ;;  %vm530_vm4 = vcmask (!%p258_p2), 1043456  }
   0x7   : > { %335 = vperm.xlu0 (!%p258_p2), %721, %v332_v0   ;;  %v810_v13 = vshrl.u32 (!%p258_p2), %v340_v9, 7  ;;  %s737_s18 = smov (!%p258_p2), 16   ;;  %s738_s19 = smov (!%p258_p2), 17   ;;  %v835_v29 = vand.u32 (!%p258_p2), 127, %v340_v9  ;;  %v842_v34 = vld [vmem:[%s915_s5] sm:$0xff] (!%p258_p2)  ;;  %vm550_vm9 = vcmask (!%p258_p2), 1041408  }
   0x8   : > { %v339_v12 = vunpack.c.0.s8 (!%p258_p2), %v338_v8  ;;  %s739_s20 = smov (!%p258_p2), 15   ;;  %s740_s21 = smov (!%p258_p2), 127   ;;  %vm546_vm10 = vcmask (!%p258_p2), 293888  }
   0x9   : > { %s741_s22 = smov (!%p258_p2), 112   ;;  %s742_s23 = smov (!%p258_p2), 113   ;;  %v396_v32 = vsub.s32 (!%p258_p2), 1, %v810_v13  ;;  %v430_v33 = vsub.s32 (!%p258_p2), 3, %v810_v13  ;;  %vm391_vm0 = vcmp.lt.s32.totalorder (!%p258_p2), %v835_v29, 16  ;;  %vm425_vm1 = vcmp.lt.s32.totalorder (!%p258_p2), %v835_v29, 1 }
   0xa   : > { %v342_v16 = vsub.s32 (!%p258_p2), %v339_v12, %v810_v13  ;;  %s743_s26 = smov (!%p258_p2), 111   ;;  %v379_v38 = vsub.s32 (!%p258_p2), 0, %v810_v13  ;;  %vm374_vm2 = vcmp.lt.s32.totalorder (!%p258_p2), %v835_v29, 17  ;;  %v413_v45 = vsub.s32 (!%p258_p2), 2, %v810_v13 }
   0xb   : > { %349 = vperm.xlu0 (!%p258_p2), %721, %v346_v2   ;;  %v397_v39 = vrot.slane (!%p258_p2), %v842_v34, %v396_v32  ;;  %v401_v40 = vrot.slane (!%p258_p2), %v847_v35, %v396_v32  ;;  %v431_v41 = vrot.slane (!%p258_p2), %v842_v34, %v430_v33  ;;  %v435_v42 = vrot.slane (!%p258_p2), %v847_v35, %v430_v33 }
   0xc   : > { %v380_v48 = vrot.slane (!%p258_p2), %v842_v34, %v379_v38  ;;  %v384_v49 = vrot.slane (!%p258_p2), %v847_v35, %v379_v38  ;;  %vm408_vm3 = vcmp.lt.s32.totalorder (!%p258_p2), %v835_v29, 15  ;;  %v414_v58 = vrot.slane (!%p258_p2), %v842_v34, %v413_v45 }
   0xd   : > { %s919_s25 = smov (!%p299_p3, %s679_s25), 1  ;;  %v418_v59 = vrot.slane %v847_v35, %v413_v45  ;;  %v447_v60 = vsub.s32 5, %v810_v13  ;;  %vm442_vm5 = vcmp.lt.s32.totalorder %v835_v29, 127  ;;  %v481_v0 = vsub.s32 7, %v810_v13 }
   0xe   : > { %s699_s30 = sshll.u32 %s919_s25, 3  ;;  %vm476_vm6 = vcmp.lt.s32.totalorder %v835_v29, 112  ;;  %vm459_vm7 = vcmp.lt.s32.totalorder %v835_v29, 113  ;;  %vm493_vm8 = vcmp.lt.s32.totalorder %v835_v29, 111  ;;  %s702_s14 = sshll.u32 %s919_s25, 4 }
   0xf   : > { %s313_s10 = scalar_lea.vmem %s912_s2, %s699_s30  ;;  %s303_s13 = scalar_lea.vmem %s910_s0, %s699_s30  ;;  %v448_v9 = vrot.slane %v842_v34, %v447_v60 }
  0x10   : > { %v322_v3 = vld [vmem:[%s313_s10] sm:$0xff]  ;;  %s308_s16 = scalar_lea.vmem %s911_s1, %s699_s30 }
  0x11   : > { %v692_v4 = vmul.f32 -1.442695, %v322_v3  ;;  %v320_v10 = vld [vmem:[%s303_s13] sm:$0xff] }
  0x12   : > { %v321_v11 = vld [vmem:[%s308_s16] sm:$0xff] }
  0x13   : > { %722 = vpow2.f32 %v692_v4  ;;  %v329_v14 = vsub.f32 %v320_v10, %v321_v11  ;;  %v452_v10 = vrot.slane %v847_v35, %v447_v60 }
  0x1d   : > { %v723_v5 = vpop.eup %722 }
  0x1e   : > { %v326_v6 = vadd.f32 1.0, %v723_v5 }
  0x20   : > { %724 = vrcp.f32 %v326_v6 }
  0x2a   : > { %v725_v15 = vpop.eup %724 }
  0x2b   : > { %v330_v17 = vmul.f32 %v725_v15, %v329_v14 }
  0x2d   : > { %v331_v19 = vadd.f32 %v330_v17, %v321_v11 }
  0x86   : > { %v336_v18 = vpop.permute.xlu0 %335 }
  0x87   : > { %v343_v20 = vrot.slane %v336_v18, %v342_v16 }
  0x89   : > { %v345_v22 = vmul.f32 %v343_v20, %v331_v19 }
  0x8a   : > { %v350_v21 = vpop.permute.xlu0 %349 }
  0x8b   : > { %v357_v23 = vrot.slane %v350_v21, %v342_v16 }
  0x8d   : > { %v359_v24 = vadd.f32 %v357_v23, %v345_v22  ;;  %v482_v22 = vrot.slane %v842_v34, %v481_v0  ;;  %v486_v23 = vrot.slane %v847_v35, %v481_v0 }
  0x8f   : > { %v813_v25 = vmax.f32 %v359_v24, 0.0  ;;  %v464_v24 = vsub.s32 6, %v810_v13 }
  0x91   : > { %421 = vrot.lane.b32.xlu0 %v813_v25, %s736_s17  ;;  %387 = vrot.lane.b32.xlu1 %v813_v25, %s737_s18  ;;  %v819_v26 = vcombine.high %v813_v25, %v813_v25  ;;  %v465_v38 = vrot.slane %v842_v34, %v464_v24  ;;  %v694_v34 = vld [vmem:[%s915_s5 + $0x18] ss:$0 sm:$0xff] }
  0x95   : > { %368 = vrot.lane.b32.xlu0 %v813_v25, %s738_s19  ;;  %389 = vrot.lane.b32.xlu1 %v819_v26, %s737_s18 }
  0x99   : > { %404 = vrot.lane.b32.xlu0 %v813_v25, %s739_s20  ;;  %423 = vrot.lane.b32.xlu1 %v819_v26, %s736_s17  ;;  %s318_s17 = scalar_lea.vmem %s917_s7, %s702_s14 }
  0x9d   : > { %438 = vrot.lane.b32.xlu0 %v813_v25, %s740_s21  ;;  %370 = vrot.lane.b32.xlu1 %v819_v26, %s738_s19 }
  0xa1   : > { %472 = vrot.lane.b32.xlu0 %v813_v25, %s741_s22  ;;  %406 = vrot.lane.b32.xlu1 %v819_v26, %s739_s20 }
  0xa5   : > { %455 = vrot.lane.b32.xlu0 %v813_v25, %s742_s23  ;;  %440 = vrot.lane.b32.xlu1 %v819_v26, %s740_s21 }
  0xa9   : > { %489 = vrot.lane.b32.xlu0 %v813_v25, %s743_s26  ;;  %474 = vrot.lane.b32.xlu1 %v819_v26, %s741_s22 }
  0xad   : > { %457 = vrot.lane.b32.xlu1 %v819_v26, %s742_s23 }
  0xb1   : > { %491 = vrot.lane.b32.xlu1 %v819_v26, %s743_s26 }
 0x103   : > { %v422_v27 = vpop.permute.xlu0 %421  ;;  %v388_v28 = vpop.permute.xlu1 %387 }
 0x107   : > { %v369_v30 = vpop.permute.xlu0 %368  ;;  %v390_v31 = vpop.permute.xlu1 %389 }
 0x108   : > { %v392_v43 = vsel %vm391_vm0, %v388_v28, %v390_v31  ;;  %v393_v44 = vsel %vm391_vm0, %v390_v31, %v388_v28 }
 0x109   : > { %v402_v51 = vmul.f32 %v397_v39, %v393_v44  ;;  %v403_v52 = vmul.f32 %v401_v40, %v392_v43  ;;  %v469_v39 = vrot.slane %v847_v35, %v464_v24 }
 0x10b   : > { %v405_v36 = vpop.permute.xlu0 %404  ;;  %v424_v37 = vpop.permute.xlu1 %423  ;;  %v508_v1 = vrot.slane %v402_v51, 4  ;;  %v509_v2 = vrot.slane %v403_v52, 4 }
 0x10c   : > { %v426_v46 = vsel %vm425_vm1, %v422_v27, %v424_v37  ;;  %v427_v47 = vsel %vm425_vm1, %v424_v37, %v422_v27 }
 0x10d   : > { %v436_v55 = vmul.f32 %v431_v41, %v427_v47  ;;  %v437_v56 = vmul.f32 %v435_v42, %v426_v46 }
 0x10f   : > { %v371_v50 = vpop.permute.xlu1 %370  ;;  %v439_v57 = vpop.permute.xlu0 %438  ;;  %v514_v5 = vrot.slane %v436_v55, 4  ;;  %v515_v6 = vrot.slane %v437_v56, 4 }
 0x110   : > { %v375_v53 = vsel %vm374_vm2, %v369_v30, %v371_v50  ;;  %v376_v54 = vsel %vm374_vm2, %v371_v50, %v369_v30 }
 0x111   : > { %v385_v61 = vmul.f32 %v380_v48, %v376_v54  ;;  %v386_v62 = vmul.f32 %v384_v49, %v375_v53  ;;  %v693_v48 = vld [vmem:[%s915_s5 + $0x10] ss:$0 sm:$0xff] }
 0x113   : > { %v407_v63 = vpop.permute.xlu1 %406  ;;  %v473_v11 = vpop.permute.xlu0 %472  ;;  %v532_v14 = vsel %vm530_vm4, %v386_v62, %v509_v2  ;;  %v531_v16 = vsel %vm530_vm4, %v385_v61, %v508_v1 }
 0x114   : > { %v409_v3 = vsel %vm408_vm3, %v405_v36, %v407_v63  ;;  %v410_v4 = vsel %vm408_vm3, %v407_v63, %v405_v36 }
 0x115   : > { %v419_v7 = vmul.f32 %v414_v58, %v410_v4  ;;  %v420_v8 = vmul.f32 %v418_v59, %v409_v3 }
 0x117   : > { %v441_v12 = vpop.permute.xlu1 %440  ;;  %v534_v15 = vsel %vm530_vm4, %v420_v8, %v515_v6  ;;  %v533_v17 = vsel %vm530_vm4, %v419_v7, %v514_v5  ;;  %v456_v33 = vpop.permute.xlu0 %455 }
 0x118   : > { %v443_v18 = vsel %vm442_vm5, %v439_v57, %v441_v12  ;;  %v444_v19 = vsel %vm442_vm5, %v441_v12, %v439_v57  ;;  %v540_v20 = vpack.c.bf16 %v534_v15, %v532_v14  ;;  %v539_v21 = vpack.c.bf16 %v533_v17, %v531_v16 }
 0x119   : > { %v453_v27 = vmul.f32 %v448_v9, %v443_v18  ;;  %v454_v28 = vmul.f32 %v452_v10, %v444_v19 }
 0x11a   : > { %557 = vmatprep.subr.bf16.mxu0 %v540_v20 }
 0x11b   : > { %558 = vmatpush1.bf16.msra.mxu0 %v539_v21  ;;  %v475_v30 = vpop.permute.xlu1 %474  ;;  %v520_v40 = vrot.slane %v453_v27, 4  ;;  %v521_v41 = vrot.slane %v454_v28, 4  ;;  %v490_v35 = vpop.permute.xlu0 %489 }
 0x11c   : > { %v477_v31 = vsel %vm476_vm6, %v473_v11, %v475_v30  ;;  %v478_v32 = vsel %vm476_vm6, %v475_v30, %v473_v11 }
 0x11d   : > { %v487_v36 = vmul.f32 %v482_v22, %v477_v31  ;;  %v488_v37 = vmul.f32 %v486_v23, %v478_v32  ;;  %v536_v50 = vsel %vm530_vm4, %v819_v26, %v521_v41  ;;  %v535_v29 = vsel %vm530_vm4, %v813_v25, %v520_v40  ;;  %v545_v25 = vld [vmem:[%s916_s6] sm:$0xf] }
 0x11f   : > { %v458_v42 = vpop.permute.xlu1 %457  ;;  %v526_v44 = vrot.slane %v487_v36, 4  ;;  %v527_v45 = vrot.slane %v488_v37, 4 }
 0x120   : > { %v460_v13 = vsel %vm459_vm7, %v456_v33, %v458_v42  ;;  %v461_v43 = vsel %vm459_vm7, %v458_v42, %v456_v33 }
 0x121   : > { %v470_v46 = vmul.f32 %v465_v38, %v460_v13  ;;  %v471_v47 = vmul.f32 %v469_v39, %v461_v43 }
 0x123   : > { %v492_v49 = vpop.permute.xlu1 %491  ;;  %v538_v51 = vsel %vm530_vm4, %v471_v47, %v527_v45  ;;  %v537_v52 = vsel %vm530_vm4, %v470_v46, %v526_v44 }
 0x124   : > { %v494_v53 = vsel %vm493_vm8, %v490_v35, %v492_v49  ;;  %v495_v54 = vsel %vm493_vm8, %v492_v49, %v490_v35  ;;  %v542_v55 = vpack.c.bf16 %v538_v51, %v536_v50  ;;  %v541_v56 = vpack.c.bf16 %v537_v52, %v535_v29 }
 0x125   : > { %v504_v57 = vmul.f32 %v693_v48, %v494_v53  ;;  %v505_v58 = vmul.f32 %v694_v34, %v495_v54 }
 0x126   : > { %559 = vmatprep.subr.bf16.mxu0 %v542_v55 }
 0x127   : > { %v543_v59 = vpack.c.bf16 %v504_v57, %v504_v57  ;;  %v544_v60 = vpack.c.bf16 %v505_v58, %v505_v58  ;;  %560 = vmatpush1.bf16.msra.mxu0 %v541_v56 }
 0x129   : > { %695 = vmatprep.subr.msk.bf16.mxu0 %vm550_vm9, %v544_v60  ;;  %v552_v26 = vsel %vm550_vm9, %v543_v59, 0 }
 0x12b   : > { %562 = vmatpush1.bf16.msra.mxu0 %v552_v26 }
 0x12e   : > { %696 = vmatmul.mubr.msk.bf16.vlgmr.msra.gmra.mrb[0].mxu0 %vm546_vm10, %v545_v25 }
 0x201   : > { %v591_v61 = vpop.f32.mrb[0].mxu0 }
 0x202   : > { %598 = vst [vmem:[%s318_s17] sm:$0xff] %v591_v61  ;;  %v593_v62 = vpop.f32.mrb[1].mxu0 }
 0x203   : > { %599 = vst [vmem:[%s318_s17 + $0x8] sm:$0xff] %v593_v62  ;;  %v595_v63 = vpop.f32.mrb[2].mxu0 }
 0x204   : > { %v596_v0 = vpop.f32.mrb[3].mxu0 }
 0x205 PF: > { %s17_s24 = sadd.s32 1, %s732_s24  }
 0x206   : > { %p14_p4 = scmp.ge.s32.totalorder %s17_s24, 4  }
 0x208   :  { %16 = sbr.rel (!%p14_p4) target bundleno = 1 (0x1), region = 84 }

</bundles_post_ra>
